<compile_context>
chip_gen: v7x
topology: tpu7x:2x2x1
jax: 0.10.0
libtpu: 0.0.40
codegen_flags: <defaults>
</compile_context>

<pallas_src>
import functools

import jax
import jax.numpy as jnp
from jax import lax
from jax.experimental import pallas as pl
from jax.experimental.pallas import tpu as pltpu


def _round_up(x, m):
    return (x + m - 1) // m * m


def _group_allsum(v, wo, cout):
    """Every lane of `v` (shape (1, wo*cout)) ends up holding the sum over all
    lanes of the same output channel (equal index mod `cout`).  Exact f32 adds
    via cyclic lane rolls (XLU) -- no MXU precision risk, no lane reshape."""
    if wo == 1:
        return v
    if wo & (wo - 1) == 0:                       # power of two: log2(wo) steps
        shift = cout
        while shift < wo * cout:
            v = v + pltpu.roll(v, shift=shift, axis=1)
            shift *= 2
        return v
    total, cur = v, v                            # general case: wo-1 steps
    for _ in range(wo - 1):
        cur = pltpu.roll(cur, shift=cout, axis=1)
        total = total + cur
    return total


# ---------------------------------------------------------------------------
# Fused kernel: conv + bias + LeakyReLU + global BatchNorm (training stats)
# ---------------------------------------------------------------------------
def _fused_conv_lrelu_bn_kernel(x_ref, w_ref, b_ref, g_ref, be_ref, o_ref, *,
                                n_imgs, hp, ho, wo, cout, kh_taps, dilation,
                                negative_slope, eps, inv_count):
    # x_ref : (N*Hp_pad, WpC_pad)  bf16  zero-padded, lane-packed images
    # w_ref : (WpC_pad, KH*WoC)    bf16  banded tap matrices, lane-concatenated
    # b_ref : (1, WoC) f32 conv bias   (lane-packed over (wo, cout))
    # g_ref : (1, WoC) f32 BN gamma    (lane-packed)
    # be_ref: (1, WoC) f32 BN beta     (lane-packed)
    # o_ref : (N*Ho, WoC) f32 output   (lane-dense; also used as VMEM staging)
    woc = wo * cout

    # -- conv: one aligned MXU matmul covering all images and all KH taps ----
    r = jnp.dot(x_ref[...], w_ref[...],
                preferred_element_type=jnp.float32)       # (N*Hp_pad, KH*WoC)

    # -- per image: row-shifted tap adds + bias + LeakyReLU -------------------
    for n in range(n_imgs):                               # static unroll
        base = n * hp
        acc = b_ref[...] + r[base:base + ho, 0:woc]       # kh = 0 tap
        for kh in range(1, kh_taps):
            off = base + kh * dilation
            acc = acc + r[off:off + ho, kh * woc:(kh + 1) * woc]
        acc = jnp.where(acc >= 0, acc, negative_slope * acc)
        o_ref[pl.ds(n * ho, ho), :] = acc                 # stage in VMEM

    # -- exact global BN statistics (biased variance), all resident in VMEM --
    act = o_ref[...]                                      # (N*Ho, WoC) f32
    rsum = jnp.sum(act, axis=0, keepdims=True)            # (1, WoC)
    mean = _group_allsum(rsum, wo, cout) * inv_count      # per-channel, lane-bcast
    cen = act - mean
    vsum = jnp.sum(cen * cen, axis=0, keepdims=True)
    var = _group_allsum(vsum, wo, cout) * inv_count       # biased variance

    r0 = lax.rsqrt(var + eps)                             # EUP seed
    inv_std = r0 * (1.5 - 0.5 * (var + eps) * r0 * r0)    # one NR step (exact-ish)
    scale = g_ref[...] * inv_std
    shift = be_ref[...] - mean * scale
    o_ref[...] = act * scale + shift


# ---------------------------------------------------------------------------
# Wrapper
# ---------------------------------------------------------------------------
_FUSED_VMEM_BUDGET = 24 * 1024 * 1024   # conservative: fits v5e/v6e/v7x scoped VMEM


def _xla_forward(x, w, b, gamma, beta, *, padding, dilation, negative_slope, eps):
    """Plain-XLA fallback for shapes whose fused working set exceeds VMEM.
    TODO(synk): replace with the tiled two-pass Pallas path (see header)."""
    out = lax.conv_general_dilated(
        x, w, window_strides=(1, 1),
        padding=[(padding, padding), (padding, padding)],
        rhs_dilation=(dilation, dilation),
        dimension_numbers=("NCHW", "OIHW", "NCHW"))
    out = out + b.reshape(1, -1, 1, 1)
    out = jnp.where(out >= 0, out, negative_slope * out)
    mean = jnp.mean(out, axis=(0, 2, 3), keepdims=True)
    var = jnp.mean((out - mean) ** 2, axis=(0, 2, 3), keepdims=True)
    return ((out - mean) * lax.rsqrt(var + eps) * gamma.reshape(1, -1, 1, 1)
            + beta.reshape(1, -1, 1, 1))


def conv2d_leakyrelu_bn(x_nchw, w_oihw, bias, gamma, beta, *,
                        padding, dilation, negative_slope, eps=1e-5):
    """Forward of Conv2DLeakyReLUBN. x_nchw: (N, Cin, H, W). Returns NCHW f32."""
    N, Cin, H, W = x_nchw.shape
    Cout, _, KH, KW = w_oihw.shape
    Ho = H + 2 * padding - dilation * (KH - 1)            # stride-1 output size
    Wo = W + 2 * padding - dilation * (KW - 1)
    Hp = H + 2 * padding
    Wp = W + 2 * padding
    Hp_pad = _round_up(Hp, 8)                             # aligned per-image starts
    WpC = Wp * Cin
    WpC_pad = _round_up(WpC, 128)                         # unmasked lane-dense LHS
    WoC = Wo * Cout
    rows_in = N * Hp_pad
    rows_out = N * Ho
    count = N * Ho * Wo

    fused_bytes = (rows_in * WpC_pad * 2                  # x (bf16)
                   + WpC_pad * KH * WoC * 2               # banded weights (bf16)
                   + rows_in * KH * WoC * 4               # matmul result (f32)
                   + 2 * rows_out * WoC * 4               # activation + output (f32)
                   + 8 * WoC * 4)                         # bias/gamma/beta/stats
    if fused_bytes > _FUSED_VMEM_BUDGET:
        return _xla_forward(x_nchw, w_oihw, bias, gamma, beta,
                            padding=padding, dilation=dilation,
                            negative_slope=negative_slope, eps=eps)

    # ---- input: NCHW -> zero-padded, lane-packed (N*Hp_pad, WpC_pad) bf16 ---
    # TODO(synk): keep this packed layout across layers / fold into the kernel.
    x_nhwc = jnp.transpose(x_nchw, (0, 2, 3, 1))
    x_p = jnp.pad(x_nhwc, ((0, 0), (padding, Hp_pad - H - padding),
                           (padding, padding), (0, 0)))
    x_p = x_p.reshape(N, Hp_pad, WpC)
    x_p = jnp.pad(x_p, ((0, 0), (0, 0), (0, WpC_pad - WpC)))
    x2 = x_p.reshape(rows_in, WpC_pad).astype(jnp.bfloat16)

    # ---- conv weight -> banded matrices, lane-concatenated over KH ----------
    # m2[w*Cin+ci, kh*WoC + wo*Cout + co] = w[co,ci,kh,kw]  iff  w == wo+kw*dil
    wt = jnp.transpose(w_oihw, (2, 3, 1, 0)).astype(jnp.float32)  # (KH,KW,Cin,Cout)
    band = (jnp.arange(Wp)[None, :, None]
            == jnp.arange(Wo)[None, None, :]
            + jnp.arange(KW)[:, None, None] * dilation)           # (KW, Wp, Wo)
    m = jnp.einsum('kab,hkcd->hacbd', band.astype(jnp.float32), wt)
    m = m.reshape(KH, WpC, WoC)
    m2 = jnp.transpose(m, (1, 0, 2)).reshape(WpC, KH * WoC)
    m2 = jnp.pad(m2, ((0, WpC_pad - WpC), (0, 0))).astype(jnp.bfloat16)

    # ---- lane-packed per-channel vectors (f32) -------------------------------
    b_p = jnp.tile(bias.astype(jnp.float32), Wo).reshape(1, WoC)
    g_p = jnp.tile(gamma.astype(jnp.float32), Wo).reshape(1, WoC)
    be_p = jnp.tile(beta.astype(jnp.float32), Wo).reshape(1, WoC)

    kern = functools.partial(
        _fused_conv_lrelu_bn_kernel, n_imgs=N, hp=Hp_pad, ho=Ho, wo=Wo,
        cout=Cout, kh_taps=KH, dilation=dilation,
        negative_slope=negative_slope, eps=eps, inv_count=1.0 / count)

    cost = pl.CostEstimate(                               # actual banded-GEMM work
        flops=2 * rows_in * WpC_pad * KH * WoC + 12 * rows_out * WoC,
        transcendentals=WoC,
        bytes_accessed=(rows_in * WpC_pad * 2 + WpC_pad * KH * WoC * 2
                        + 3 * WoC * 4 + rows_out * WoC * 4))

    y2 = pl.pallas_call(
        kern,
        # Whole problem is one VMEM-resident step (global BN needs all data);
        # larger shapes take the fallback path above.
        grid=(1,),
        in_specs=[
            pl.BlockSpec((rows_in, WpC_pad), lambda i: (0, 0)),
            pl.BlockSpec((WpC_pad, KH * WoC), lambda i: (0, 0)),
            pl.BlockSpec((1, WoC), lambda i: (0, 0)),
            pl.BlockSpec((1, WoC), lambda i: (0, 0)),
            pl.BlockSpec((1, WoC), lambda i: (0, 0)),
        ],
        out_specs=pl.BlockSpec((rows_out, WoC), lambda i: (0, 0)),
        out_shape=jax.ShapeDtypeStruct((rows_out, WoC), jnp.float32),
        compiler_params=pltpu.CompilerParams(
            dimension_semantics=("arbitrary",),
            vmem_limit_bytes=32 * 1024 * 1024),
        cost_estimate=cost,
    )(x2, m2, b_p, g_p, be_p)

    # ---- lane-packed -> NCHW (single cheap relayout; see TODO above) --------
    return jnp.transpose(y2.reshape(N, Ho, Wo, Cout), (0, 3, 1, 2))


conv2d_leakyrelu_bn_jit = jax.jit(
    conv2d_leakyrelu_bn,
    static_argnames=("padding", "dilation", "negative_slope", "eps"))


def _reference(x, w, b, gamma, beta, *, padding, dilation, negative_slope,
               eps=1e-5):
    """Pure-JAX reference mirroring the PyTorch forward (conv inputs rounded to
    bf16 so it is apples-to-apples with the bf16 MXU kernel)."""
    xb = x.astype(jnp.bfloat16).astype(jnp.float32)
    wb = w.astype(jnp.bfloat16).astype(jnp.float32)
    out = lax.conv_general_dilated(
        xb, wb, window_strides=(1, 1),
        padding=[(padding, padding), (padding, padding)],
        rhs_dilation=(dilation, dilation),
        dimension_numbers=("NCHW", "OIHW", "NCHW"),
        precision=lax.Precision.HIGHEST)
    out = out + b.reshape(1, -1, 1, 1)
    out = jnp.where(out >= 0, out, negative_slope * out)
    mean = jnp.mean(out, axis=(0, 2, 3), keepdims=True)
    var = jnp.mean((out - mean) ** 2, axis=(0, 2, 3), keepdims=True)
    out = (out - mean) / jnp.sqrt(var + eps)
    return out * gamma.reshape(1, -1, 1, 1) + beta.reshape(1, -1, 1, 1)


if __name__ == "__main__":
    # Module config (matches Conv2DLeakyReLUBN.__init__ signature)
    input_channels = 4
    layer_width = 8
    kernel_size = 3
    padding = 1
    dilation = 1
    negative_slope = 0.1

    key = jax.random.PRNGKey(0)
    kx, kw, kb, kg, kbe = jax.random.split(key, 5)
    N, H, W = 2, 16, 16
    x = jax.random.normal(kx, (N, input_channels, H, W), dtype=jnp.float32)

    # Deterministic synthetic init (shapes follow nn.Conv2d / nn.BatchNorm2d).
    fan_in = input_channels * kernel_size * kernel_size
    bound = 1.0 / (fan_in ** 0.5)
    w = jax.random.uniform(
        kw, (layer_width, input_channels, kernel_size, kernel_size),
        minval=-bound, maxval=bound, dtype=jnp.float32)
    b = jax.random.uniform(kb, (layer_width,), minval=-bound, maxval=bound,
                           dtype=jnp.float32)
    gamma = 1.0 + 0.1 * jax.random.normal(kg, (layer_width,), jnp.float32)
    beta = 0.1 * jax.random.normal(kbe, (layer_width,), jnp.float32)

    out = conv2d_leakyrelu_bn_jit(x, w, b, gamma, beta,
                                  padding=padding, dilation=dilation,
                                  negative_slope=negative_slope)
    out = jax.block_until_ready(out)

    ref = _reference(x, w, b, gamma, beta,
                     padding=padding, dilation=dilation,
                     negative_slope=negative_slope)
    assert out.shape == (N, layer_width, H, W), out.shape
    max_err = float(jnp.max(jnp.abs(out - ref)))
    assert jnp.allclose(out, ref, atol=5e-4, rtol=5e-4), max_err
    print("KERNEL_OK")
</pallas_src>

<mosaic_0001>
module attributes {stable_mosaic.version = 11 : i64} {
  func.func @_fused_conv_lrelu_bn_kernel(%arg0: i32, %arg1: memref<48x128xbf16, #tpu.memory_space<vmem>>, %arg2: memref<128x384xbf16, #tpu.memory_space<vmem>>, %arg3: memref<1x128xf32, #tpu.memory_space<vmem>>, %arg4: memref<1x128xf32, #tpu.memory_space<vmem>>, %arg5: memref<1x128xf32, #tpu.memory_space<vmem>>, %arg6: memref<32x128xf32, #tpu.memory_space<vmem>>) attributes {dimension_semantics = [#tpu.dimension_semantics<arbitrary>], iteration_bounds = array<i64: 1>, scalar_prefetch = 0 : i64, scratch_operands = 0 : i64, tpu.core_type = #tpu.core_type<tc>, window_params = [{pipeline_mode = #tpu.pipeline_mode<synchronous>, transform_indices = @transform_0, window_bounds = array<i64: 48, 128>}, {pipeline_mode = #tpu.pipeline_mode<synchronous>, transform_indices = @transform_1, window_bounds = array<i64: 128, 384>}, {pipeline_mode = #tpu.pipeline_mode<synchronous>, transform_indices = @transform_2, window_bounds = array<i64: 1, 128>}, {pipeline_mode = #tpu.pipeline_mode<synchronous>, transform_indices = @transform_3, window_bounds = array<i64: 1, 128>}, {pipeline_mode = #tpu.pipeline_mode<synchronous>, transform_indices = @transform_4, window_bounds = array<i64: 1, 128>}, {pipeline_mode = #tpu.pipeline_mode<synchronous>, transform_indices = @transform_5, window_bounds = array<i64: 32, 128>}]} {
    %c0 = arith.constant 0 : index
    %c0_0 = arith.constant 0 : index
    %0 = vector.load %arg1[%c0, %c0_0] : memref<48x128xbf16, #tpu.memory_space<vmem>>, vector<48x128xbf16>
    %c0_1 = arith.constant 0 : index
    %c0_2 = arith.constant 0 : index
    %1 = vector.load %arg2[%c0_1, %c0_2] : memref<128x384xbf16, #tpu.memory_space<vmem>>, vector<128x384xbf16>
    %cst = arith.constant dense<0.000000e+00> : vector<48x384xf32>
    %2 = tpu.matmul %0, %1, %cst {dimension_numbers = #tpu.dot_dimension_numbers<[1], [0], [0], [1], [0, 0, 1, 1], [], []>} : vector<48x128xbf16>, vector<128x384xbf16>, vector<48x384xf32> -> vector<48x384xf32>
    %c0_3 = arith.constant 0 : index
    %c0_4 = arith.constant 0 : index
    %3 = vector.load %arg3[%c0_3, %c0_4] : memref<1x128xf32, #tpu.memory_space<vmem>>, vector<1x128xf32>
    %4 = vector.extract_strided_slice %2 {offsets = [0, 0], sizes = [16, 128], strides = [1, 1]} : vector<48x384xf32> to vector<16x128xf32>
    %5 = vector.broadcast %3 : vector<1x128xf32> to vector<16x128xf32>
    %6 = arith.addf %5, %4 : vector<16x128xf32>
    %7 = vector.extract_strided_slice %2 {offsets = [1, 128], sizes = [16, 128], strides = [1, 1]} : vector<48x384xf32> to vector<16x128xf32>
    %8 = arith.addf %6, %7 : vector<16x128xf32>
    %9 = vector.extract_strided_slice %2 {offsets = [2, 256], sizes = [16, 128], strides = [1, 1]} : vector<48x384xf32> to vector<16x128xf32>
    %10 = arith.addf %8, %9 : vector<16x128xf32>
    %cst_5 = arith.constant 0.000000e+00 : f32
    %11 = vector.broadcast %cst_5 : f32 to vector<16x128xf32>
    %12 = arith.cmpf oge, %10, %11 : vector<16x128xf32>
    %cst_6 = arith.constant 1.000000e-01 : f32
    %13 = vector.broadcast %cst_6 : f32 to vector<16x128xf32>
    %14 = arith.mulf %13, %10 : vector<16x128xf32>
    %15 = arith.select %12, %10, %14 : vector<16x128xi1>, vector<16x128xf32>
    %c0_7 = arith.constant 0 : index
    %c0_8 = arith.constant 0 : index
    %16 = vector.load %arg6[%c0_7, %c0_8] : memref<32x128xf32, #tpu.memory_space<vmem>>, vector<16x128xf32>
    tpu.vector_store %arg6[%c0_7, %c0_8], %15 {strides = array<i32>} : memref<32x128xf32, #tpu.memory_space<vmem>>, vector<16x128xf32>,
    %c0_9 = arith.constant 0 : index
    %c0_10 = arith.constant 0 : index
    %17 = vector.load %arg3[%c0_9, %c0_10] : memref<1x128xf32, #tpu.memory_space<vmem>>, vector<1x128xf32>
    %18 = vector.extract_strided_slice %2 {offsets = [24, 0], sizes = [16, 128], strides = [1, 1]} : vector<48x384xf32> to vector<16x128xf32>
    %19 = vector.broadcast %17 : vector<1x128xf32> to vector<16x128xf32>
    %20 = arith.addf %19, %18 : vector<16x128xf32>
    %21 = vector.extract_strided_slice %2 {offsets = [25, 128], sizes = [16, 128], strides = [1, 1]} : vector<48x384xf32> to vector<16x128xf32>
    %22 = arith.addf %20, %21 : vector<16x128xf32>
    %23 = vector.extract_strided_slice %2 {offsets = [26, 256], sizes = [16, 128], strides = [1, 1]} : vector<48x384xf32> to vector<16x128xf32>
    %24 = arith.addf %22, %23 : vector<16x128xf32>
    %cst_11 = arith.constant 0.000000e+00 : f32
    %25 = vector.broadcast %cst_11 : f32 to vector<16x128xf32>
    %26 = arith.cmpf oge, %24, %25 : vector<16x128xf32>
    %cst_12 = arith.constant 1.000000e-01 : f32
    %27 = vector.broadcast %cst_12 : f32 to vector<16x128xf32>
    %28 = arith.mulf %27, %24 : vector<16x128xf32>
    %29 = arith.select %26, %24, %28 : vector<16x128xi1>, vector<16x128xf32>
    %c16 = arith.constant 16 : index
    %c0_13 = arith.constant 0 : index
    %30 = vector.load %arg6[%c16, %c0_13] : memref<32x128xf32, #tpu.memory_space<vmem>>, vector<16x128xf32>
    tpu.vector_store %arg6[%c16, %c0_13], %29 {strides = array<i32>} : memref<32x128xf32, #tpu.memory_space<vmem>>, vector<16x128xf32>,
    %c0_14 = arith.constant 0 : index
    %c0_15 = arith.constant 0 : index
    %31 = vector.load %arg6[%c0_14, %c0_15] : memref<32x128xf32, #tpu.memory_space<vmem>>, vector<32x128xf32>
    %cst_16 = arith.constant dense<0.000000e+00> : vector<128xf32>
    %32 = vector.multi_reduction <add>, %31, %cst_16 [0] : vector<32x128xf32> to vector<128xf32>
    %33 = vector.shape_cast %32 : vector<128xf32> to vector<1x128xf32>
    %c8_i32 = arith.constant 8 : i32
    %34 = tpu.dynamic_rotate %33 by %c8_i32 dim 1 : vector<1x128xf32>, i32 -> vector<1x128xf32>
    %35 = arith.addf %33, %34 : vector<1x128xf32>
    %c16_i32 = arith.constant 16 : i32
    %36 = tpu.dynamic_rotate %35 by %c16_i32 dim 1 : vector<1x128xf32>, i32 -> vector<1x128xf32>
    %37 = arith.addf %35, %36 : vector<1x128xf32>
    %c32_i32 = arith.constant 32 : i32
    %38 = tpu.dynamic_rotate %37 by %c32_i32 dim 1 : vector<1x128xf32>, i32 -> vector<1x128xf32>
    %39 = arith.addf %37, %38 : vector<1x128xf32>
    %c64_i32 = arith.constant 64 : i32
    %40 = tpu.dynamic_rotate %39 by %c64_i32 dim 1 : vector<1x128xf32>, i32 -> vector<1x128xf32>
    %41 = arith.addf %39, %40 : vector<1x128xf32>
    %cst_17 = arith.constant 0.001953125 : f32
    %42 = vector.broadcast %cst_17 : f32 to vector<1x128xf32>
    %43 = arith.mulf %41, %42 : vector<1x128xf32>
    %44 = vector.broadcast %43 : vector<1x128xf32> to vector<32x128xf32>
    %45 = arith.subf %31, %44 : vector<32x128xf32>
    %46 = arith.mulf %45, %45 : vector<32x128xf32>
    %cst_18 = arith.constant dense<0.000000e+00> : vector<128xf32>
    %47 = vector.multi_reduction <add>, %46, %cst_18 [0] : vector<32x128xf32> to vector<128xf32>
    %48 = vector.shape_cast %47 : vector<128xf32> to vector<1x128xf32>
    %c8_i32_19 = arith.constant 8 : i32
    %49 = tpu.dynamic_rotate %48 by %c8_i32_19 dim 1 : vector<1x128xf32>, i32 -> vector<1x128xf32>
    %50 = arith.addf %48, %49 : vector<1x128xf32>
    %c16_i32_20 = arith.constant 16 : i32
    %51 = tpu.dynamic_rotate %50 by %c16_i32_20 dim 1 : vector<1x128xf32>, i32 -> vector<1x128xf32>
    %52 = arith.addf %50, %51 : vector<1x128xf32>
    %c32_i32_21 = arith.constant 32 : i32
    %53 = tpu.dynamic_rotate %52 by %c32_i32_21 dim 1 : vector<1x128xf32>, i32 -> vector<1x128xf32>
    %54 = arith.addf %52, %53 : vector<1x128xf32>
    %c64_i32_22 = arith.constant 64 : i32
    %55 = tpu.dynamic_rotate %54 by %c64_i32_22 dim 1 : vector<1x128xf32>, i32 -> vector<1x128xf32>
    %56 = arith.addf %54, %55 : vector<1x128xf32>
    %cst_23 = arith.constant 0.001953125 : f32
    %57 = vector.broadcast %cst_23 : f32 to vector<1x128xf32>
    %58 = arith.mulf %56, %57 : vector<1x128xf32>
    %cst_24 = arith.constant 9.99999974E-6 : f32
    %59 = vector.broadcast %cst_24 : f32 to vector<1x128xf32>
    %60 = arith.addf %58, %59 : vector<1x128xf32>
    %61 = math.rsqrt %60 : vector<1x128xf32>
    %cst_25 = arith.constant 9.99999974E-6 : f32
    %62 = vector.broadcast %cst_25 : f32 to vector<1x128xf32>
    %63 = arith.addf %58, %62 : vector<1x128xf32>
    %cst_26 = arith.constant 5.000000e-01 : f32
    %64 = vector.broadcast %cst_26 : f32 to vector<1x128xf32>
    %65 = arith.mulf %64, %63 : vector<1x128xf32>
    %66 = arith.mulf %65, %61 : vector<1x128xf32>
    %67 = arith.mulf %66, %61 : vector<1x128xf32>
    %cst_27 = arith.constant 1.500000e+00 : f32
    %68 = vector.broadcast %cst_27 : f32 to vector<1x128xf32>
    %69 = arith.subf %68, %67 : vector<1x128xf32>
    %70 = arith.mulf %61, %69 : vector<1x128xf32>
    %c0_28 = arith.constant 0 : index
    %c0_29 = arith.constant 0 : index
    %71 = vector.load %arg4[%c0_28, %c0_29] : memref<1x128xf32, #tpu.memory_space<vmem>>, vector<1x128xf32>
    %72 = arith.mulf %71, %70 : vector<1x128xf32>
    %c0_30 = arith.constant 0 : index
    %c0_31 = arith.constant 0 : index
    %73 = vector.load %arg5[%c0_30, %c0_31] : memref<1x128xf32, #tpu.memory_space<vmem>>, vector<1x128xf32>
    %74 = arith.mulf %43, %72 : vector<1x128xf32>
    %75 = arith.subf %73, %74 : vector<1x128xf32>
    %76 = vector.broadcast %72 : vector<1x128xf32> to vector<32x128xf32>
    %77 = arith.mulf %31, %76 : vector<32x128xf32>
    %78 = vector.broadcast %75 : vector<1x128xf32> to vector<32x128xf32>
    %79 = arith.addf %77, %78 : vector<32x128xf32>
    %c0_32 = arith.constant 0 : index
    %c0_33 = arith.constant 0 : index
    %80 = vector.load %arg6[%c0_32, %c0_33] : memref<32x128xf32, #tpu.memory_space<vmem>>, vector<32x128xf32>
    tpu.vector_store %arg6[%c0_32, %c0_33], %79 {strides = array<i32>} : memref<32x128xf32, #tpu.memory_space<vmem>>, vector<32x128xf32>,
    return
  }
  func.func @transform_0(%arg0: i32) -> (i32, i32) {
    %c0_i32 = arith.constant 0 : i32
    %c0_i32_0 = arith.constant 0 : i32
    %c0_i32_1 = arith.constant 0 : i32
    return %c0_i32, %c0_i32_0 : i32, i32
  }
  func.func @transform_1(%arg0: i32) -> (i32, i32) {
    %c0_i32 = arith.constant 0 : i32
    %c0_i32_0 = arith.constant 0 : i32
    %c0_i32_1 = arith.constant 0 : i32
    return %c0_i32, %c0_i32_0 : i32, i32
  }
  func.func @transform_2(%arg0: i32) -> (i32, i32) {
    %c0_i32 = arith.constant 0 : i32
    %c0_i32_0 = arith.constant 0 : i32
    %c0_i32_1 = arith.constant 0 : i32
    return %c0_i32, %c0_i32_0 : i32, i32
  }
  func.func @transform_3(%arg0: i32) -> (i32, i32) {
    %c0_i32 = arith.constant 0 : i32
    %c0_i32_0 = arith.constant 0 : i32
    %c0_i32_1 = arith.constant 0 : i32
    return %c0_i32, %c0_i32_0 : i32, i32
  }
  func.func @transform_4(%arg0: i32) -> (i32, i32) {
    %c0_i32 = arith.constant 0 : i32
    %c0_i32_0 = arith.constant 0 : i32
    %c0_i32_1 = arith.constant 0 : i32
    return %c0_i32, %c0_i32_0 : i32, i32
  }
  func.func @transform_5(%arg0: i32) -> (i32, i32) {
    %c0_i32 = arith.constant 0 : i32
    %c0_i32_0 = arith.constant 0 : i32
    %c0_i32_1 = arith.constant 0 : i32
    return %c0_i32, %c0_i32_0 : i32, i32
  }
}

</mosaic_0001>

<bundles_post_ra>
// kernel: tile.18
= control target key start
LH: loop header
LB: loop body
LE: loop exit
PB: predicated region body
PF: predicated region fallthrough
CT: control target
= control target key end

     0   :  { %s28_s0 = inlined_call_operand.vmem [shape: f32[8], index: 0, kind: input, shape index: {}]   ;;  %s29_s1 = inlined_call_operand.vmem [shape: f32[16,8], index: 1, kind: output, shape index: {}]  }
   0x1   :  { %v4_v0 = vld [vmem:[%s28_s0] ss:$0 sm:$0xff] }
   0x2   :  { %5 = vst [vmem:[%s29_s1] sm:$0xff] %v4_v0  ;;  %8 = vst [vmem:[%s29_s1 + $0x8] sm:$0xff] %v4_v0 }

// kernel: tile.19
= control target key start
LH: loop header
LB: loop body
LE: loop exit
PB: predicated region body
PF: predicated region fallthrough
CT: control target
= control target key end

     0   :  { %s131_s10 = smov 120   ;;  %s132_s11 = smov 104   ;;  %vm3_vm0 = vcmask 64512   ;;  %vm9_vm1 = vcmask 1048512   ;;  %vm15_vm2 = vcmask 982912   ;;  %vm21_vm3 = vcmask 917312   ;;  %s207_s0 = inlined_call_operand.vmem [shape: f32[16,8], index: 0, kind: input, shape index: {}]   ;;  %s208_s1 = inlined_call_operand.vmem [shape: f32[1,128], index: 1, kind: output, shape index: {}]  }
   0x1   :  { %v101_v0 = vld [vmem:[%s207_s0 + $0xf] sm:$0x1]   ;;  %v103_v1 = vld [vmem:[%s207_s0 + $0xd] sm:$0x1]   ;;  %v102_v2 = vld [vmem:[%s207_s0 + $0xe] sm:$0x1]  }
   0x2   :  { %7 = vrot.lane.b32.xlu0 %v101_v0, %s131_s10  ;;  %19 = vrot.lane.b32.xlu1 %v103_v1, %s132_s11  ;;  %v104_v3 = vld [vmem:[%s207_s0 + $0xc] sm:$0x1]   ;;  %s133_s16 = smov 112   ;;  %s134_s17 = smov 96   ;;  %v105_v4 = vld [vmem:[%s207_s0 + $0xb] sm:$0x1]  }
   0x3   :  { %v106_v5 = vld [vmem:[%s207_s0 + $0xa] sm:$0x1]   ;;  %v2_v6 = vld [vmem:[%s207_s0] sm:$0x1]   ;;  %s135_s24 = smov 88   ;;  %s136_s25 = smov 80  }
   0x4   :  { %4 = vst.msk [vmem:[#allocation0] sm:$0x1] %vm3_vm0, %v2_v6   ;;  %v107_v7 = vld [vmem:[%s207_s0 + $0x9] sm:$0x1]   ;;  %v108_v8 = vld [vmem:[%s207_s0 + $0x8] sm:$0x1]  }
   0x5   :  { %s137_s30 = smov 72   ;;  %s138_s2 = smov 64   ;;  %v109_v9 = vld [vmem:[%s207_s0 + $0x7] sm:$0x1]   ;;  %v110_v10 = vld [vmem:[%s207_s0 + $0x6] sm:$0x1]  }
   0x6   :  { %13 = vrot.lane.b32.xlu0 %v102_v2, %s133_s16  ;;  %25 = vrot.lane.b32.xlu1 %v104_v3, %s134_s17  ;;  %s139_s7 = smov 56   ;;  %s140_s8 = smov 48   ;;  %v111_v11 = vld [vmem:[%s207_s0 + $0x5] sm:$0x1]   ;;  %v112_v12 = vld [vmem:[%s207_s0 + $0x4] sm:$0x1]  }
   0x7   :  { %s141_s13 = smov 40   ;;  %s142_s14 = smov 32   ;;  %v113_v13 = vld [vmem:[%s207_s0 + $0x3] sm:$0x1]   ;;  %v114_v14 = vld [vmem:[%s207_s0 + $0x2] sm:$0x1]  }
   0x8   :  { %s143_s19 = smov 24   ;;  %s144_s20 = smov 16   ;;  %v115_v15 = vld [vmem:[%s207_s0 + $0x1] sm:$0x1]   ;;  %vm27_vm4 = vcmask 851712   ;;  %vm33_vm5 = vcmask 786112  }
   0x9   :  { %s145_s0 = smov 8   ;;  %vm39_vm6 = vcmask 720512   ;;  %vm45_vm7 = vcmask 654912   ;;  %vm51_vm8 = vcmask 589312   ;;  %vm57_vm9 = vcmask 523712  }
   0xa   :  { %31 = vrot.lane.b32.xlu0 %v105_v4, %s135_s24  ;;  %37 = vrot.lane.b32.xlu1 %v106_v5, %s136_s25  ;;  %vm63_vm10 = vcmask 458112   ;;  %vm69_vm11 = vcmask 392512   ;;  %vm75_vm12 = vcmask 326912   ;;  %vm81_vm13 = vcmask 261312  }
   0xb   :  { %vm87_vm14 = vcmask 195712   ;;  %vm93_vm15 = vcmask 130112  }
   0xe   :  { %43 = vrot.lane.b32.xlu0 %v107_v7, %s137_s30  ;;  %49 = vrot.lane.b32.xlu1 %v108_v8, %s138_s2 }
  0x12   :  { %55 = vrot.lane.b32.xlu0 %v109_v9, %s139_s7  ;;  %61 = vrot.lane.b32.xlu1 %v110_v10, %s140_s8 }
  0x16   :  { %67 = vrot.lane.b32.xlu0 %v111_v11, %s141_s13  ;;  %73 = vrot.lane.b32.xlu1 %v112_v12, %s142_s14 }
  0x1a   :  { %79 = vrot.lane.b32.xlu0 %v113_v13, %s143_s19  ;;  %85 = vrot.lane.b32.xlu1 %v114_v14, %s144_s20 }
  0x1e   :  { %91 = vrot.lane.b32.xlu0 %v115_v15, %s145_s0 }
  0x74   :  { %v8_v16 = vpop.permute.xlu0 %7   ;;  %v20_v17 = vpop.permute.xlu1 %19  }
  0x75   :  { %10 = vst.msk [vmem:[#allocation0] sm:$0x1] %vm9_vm1, %v8_v16  }
  0x78   :  { %v14_v18 = vpop.permute.xlu0 %13   ;;  %v26_v19 = vpop.permute.xlu1 %25  }
  0x79   :  { %16 = vst.msk [vmem:[#allocation0] sm:$0x1] %vm15_vm2, %v14_v18  }
  0x7a   :  { %22 = vst.msk [vmem:[#allocation0] sm:$0x1] %vm21_vm3, %v20_v17  }
  0x7b   :  { %28 = vst.msk [vmem:[#allocation0] sm:$0x1] %vm27_vm4, %v26_v19  }
  0x7c   :  { %v32_v20 = vpop.permute.xlu0 %31   ;;  %v38_v21 = vpop.permute.xlu1 %37  }
  0x7d   :  { %34 = vst.msk [vmem:[#allocation0] sm:$0x1] %vm33_vm5, %v32_v20  }
  0x7e   :  { %40 = vst.msk [vmem:[#allocation0] sm:$0x1] %vm39_vm6, %v38_v21  }
  0x80   :  { %v44_v22 = vpop.permute.xlu0 %43   ;;  %v50_v23 = vpop.permute.xlu1 %49  }
  0x81   :  { %46 = vst.msk [vmem:[#allocation0] sm:$0x1] %vm45_vm7, %v44_v22  }
  0x82   :  { %52 = vst.msk [vmem:[#allocation0] sm:$0x1] %vm51_vm8, %v50_v23  }
  0x84   :  { %v56_v24 = vpop.permute.xlu0 %55   ;;  %v62_v25 = vpop.permute.xlu1 %61  }
  0x85   :  { %58 = vst.msk [vmem:[#allocation0] sm:$0x1] %vm57_vm9, %v56_v24  }
  0x86   :  { %64 = vst.msk [vmem:[#allocation0] sm:$0x1] %vm63_vm10, %v62_v25  }
  0x88   :  { %v68_v26 = vpop.permute.xlu0 %67   ;;  %v74_v27 = vpop.permute.xlu1 %73  }
  0x89   :  { %70 = vst.msk [vmem:[#allocation0] sm:$0x1] %vm69_vm11, %v68_v26  }
  0x8a   :  { %76 = vst.msk [vmem:[#allocation0] sm:$0x1] %vm75_vm12, %v74_v27  }
  0x8c   :  { %v80_v28 = vpop.permute.xlu0 %79   ;;  %v86_v29 = vpop.permute.xlu1 %85  }
  0x8d   :  { %82 = vst.msk [vmem:[#allocation0] sm:$0x1] %vm81_vm13, %v80_v28  }
  0x8e   :  { %88 = vst.msk [vmem:[#allocation0] sm:$0x1] %vm87_vm14, %v86_v29  }
  0x90   :  { %v92_v30 = vpop.permute.xlu0 %91  }
  0x91   :  { %94 = vst.msk [vmem:[#allocation0] sm:$0x1] %vm93_vm15, %v92_v30  }
  0x98   :  { %v98_v31 = vld [vmem:[#allocation0] sm:$0x1] }
  0x99   :  { %100 = vst [vmem:[%s208_s1] sm:$0x1] %v98_v31 }

// kernel: conv2d_leakyrelu_bn.1
= control target key start
LH: loop header
LB: loop body
LE: loop exit
PB: predicated region body
PF: predicated region fallthrough
CT: control target
= control target key end

     0   :  { %v619_v0 = vmov 0.0   ;;  %vm620_vm0 = vmmov 0   ;;  %v621_v3 = vmov 0   ;;  %vm348_vm1 = vcmask 1045504   ;;  %s624_s23 = smov 32   ;;  %s625_s24 = smov 64   ;;  %s811_s1 = inlined_call_operand.vmem [shape: bf16[128,384], index: 1, kind: input, shape index: {}]   ;;  %s812_s0 = inlined_call_operand.vmem [shape: bf16[48,128], index: 0, kind: input, shape index: {}]   ;;  %s813_s2 = inlined_call_operand.vmem [shape: f32[1,128], index: 2, kind: input, shape index: {}]   ;;  %s814_s3 = inlined_call_operand.vmem [shape: f32[1,128], index: 3, kind: input, shape index: {}]   ;;  %s815_s4 = inlined_call_operand.vmem [shape: f32[1,128], index: 4, kind: input, shape index: {}]   ;;  %s816_s5 = inlined_call_operand.vmem [shape: f32[32,128], index: 5, kind: output, shape index: {}]  }
   0x1   :  { %547 = vmatprep.subr.bf16.mxu1 %v619_v0  ;;  %v582_v1 = vld [vmem:[%s811_s1 + $0x4] ss:$12 sps:$4 sm:$0xff]   ;;  %563 = vmatprep.mubr.msk.bf16.mxu1 %vm620_vm0, %v619_v0  ;;  %v584_v2 = vld [vmem:[%s811_s1 + $0x8] ss:$12 sps:$4 sm:$0xff]   ;;  %v585_v4 = vld [vmem:[%s811_s1] ss:$12 sps:$4 sm:$0xff]  }
   0x2   :  { %237 = vmatprep.mubr.bf16.mxu0 %v621_v3  ;;  %205 = vmatprep.subr.bf16.mxu0 %v582_v1  ;;  %v586_v5 = vld [vmem:[%s811_s1 + $0x1c] ss:$12 sps:$4 sm:$0xff]   ;;  %v588_v6 = vld [vmem:[%s811_s1 + $0x20] ss:$12 sps:$4 sm:$0xff]   ;;  %v589_v7 = vld [vmem:[%s811_s1 + $0x18] ss:$12 sps:$4 sm:$0xff]  }
   0x3   :  { %548 = vmatpush3.bf16.msra.mxu1 %v584_v2  ;;  %206 = vmatpush1.bf16.msra.mxu0 %v585_v4  ;;  %v590_v8 = vld [vmem:[%s811_s1 + $0x34] ss:$12 sps:$4 sm:$0xff]   ;;  %v592_v9 = vld [vmem:[%s811_s1 + $0x38] ss:$12 sps:$4 sm:$0xff]   ;;  %v593_v10 = vld [vmem:[%s811_s1 + $0x30] ss:$12 sps:$4 sm:$0xff]  }
   0x4   :  { %549 = vmatprep.subr.bf16.mxu1 %v619_v0  ;;  %207 = vmatprep.subr.bf16.mxu0 %v586_v5  ;;  %v594_v11 = vld [vmem:[%s811_s1 + $0x4c] ss:$12 sps:$4 sm:$0xff]   ;;  %v596_v12 = vld [vmem:[%s811_s1 + $0x50] ss:$12 sps:$4 sm:$0xff]   ;;  %v597_v13 = vld [vmem:[%s811_s1 + $0x48] ss:$12 sps:$4 sm:$0xff]  }
   0x5   :  { %v598_v14 = vld [vmem:[%s811_s1 + $0x64] ss:$12 sps:$4 sm:$0xff]   ;;  %v600_v15 = vld [vmem:[%s811_s1 + $0x68] ss:$12 sps:$4 sm:$0xff]   ;;  %v601_v16 = vld [vmem:[%s811_s1 + $0x60] ss:$12 sps:$4 sm:$0xff]  }
   0x6   :  { %v602_v17 = vld [vmem:[%s811_s1 + $0x7c] ss:$12 sps:$4 sm:$0xff]   ;;  %v604_v18 = vld [vmem:[%s811_s1 + $0x80] ss:$12 sps:$4 sm:$0xff]   ;;  %v605_v19 = vld [vmem:[%s811_s1 + $0x78] ss:$12 sps:$4 sm:$0xff]  }
   0x7   :  { %550 = vmatpush3.bf16.msra.mxu1 %v588_v6  ;;  %208 = vmatpush1.bf16.msra.mxu0 %v589_v7  ;;  %v606_v20 = vld [vmem:[%s811_s1 + $0x94] ss:$12 sps:$4 sm:$0xff]   ;;  %v608_v21 = vld [vmem:[%s811_s1 + $0x98] ss:$12 sps:$4 sm:$0xff]   ;;  %v609_v22 = vld [vmem:[%s811_s1 + $0x90] ss:$12 sps:$4 sm:$0xff]  }
   0x8   :  { %551 = vmatprep.subr.bf16.mxu1 %v619_v0  ;;  %209 = vmatprep.subr.bf16.mxu0 %v590_v8  ;;  %v610_v23 = vld [vmem:[%s811_s1 + $0xac] ss:$12 sps:$4 sm:$0xff]   ;;  %v612_v24 = vld [vmem:[%s811_s1 + $0xb0] ss:$12 sps:$4 sm:$0xff]   ;;  %v613_v25 = vld [vmem:[%s811_s1 + $0xa8] ss:$12 sps:$4 sm:$0xff]  }
   0x9   :  { %v614_v26 = vld [vmem:[%s812_s0] sm:$0xff]   ;;  %v615_v27 = vld [vmem:[%s812_s0 + $0x8] sm:$0xff]   ;;  %v616_v28 = vld [vmem:[%s812_s0 + $0x10] sm:$0xff]   ;;  %vm335_vm2 = vcmask 1046528   ;;  %s622_s0 = smov 8  }
   0xa   :  { %v534_v35 = vld [vmem:[%s813_s2] ss:$0 sm:$0xff]  ;;  %s623_s2 = smov 16  }
   0xb   :  { %552 = vmatpush3.bf16.msra.mxu1 %v592_v9  ;;  %210 = vmatpush1.bf16.msra.mxu0 %v593_v10 }
   0xc   :  { %553 = vmatprep.subr.bf16.mxu1 %v619_v0  ;;  %211 = vmatprep.subr.bf16.mxu0 %v594_v11 }
   0xf   :  { %554 = vmatpush3.bf16.msra.mxu1 %v596_v12  ;;  %212 = vmatpush1.bf16.msra.mxu0 %v597_v13 }
  0x10   :  { %555 = vmatprep.subr.bf16.mxu1 %v619_v0  ;;  %213 = vmatprep.subr.bf16.mxu0 %v598_v14 }
  0x13   :  { %556 = vmatpush3.bf16.msra.mxu1 %v600_v15  ;;  %214 = vmatpush1.bf16.msra.mxu0 %v601_v16 }
  0x14   :  { %557 = vmatprep.subr.bf16.mxu1 %v619_v0  ;;  %215 = vmatprep.subr.bf16.mxu0 %v602_v17 }
  0x17   :  { %558 = vmatpush3.bf16.msra.mxu1 %v604_v18  ;;  %216 = vmatpush1.bf16.msra.mxu0 %v605_v19 }
  0x18   :  { %559 = vmatprep.subr.bf16.mxu1 %v619_v0  ;;  %217 = vmatprep.subr.bf16.mxu0 %v606_v20 }
  0x1b   :  { %560 = vmatpush3.bf16.msra.mxu1 %v608_v21  ;;  %218 = vmatpush1.bf16.msra.mxu0 %v609_v22 }
  0x1c   :  { %561 = vmatprep.subr.bf16.mxu1 %v619_v0  ;;  %219 = vmatprep.subr.bf16.mxu0 %v610_v23 }
  0x1f   :  { %562 = vmatpush3.bf16.msra.mxu1 %v612_v24  ;;  %220 = vmatpush1.bf16.msra.mxu0 %v613_v25 }
  0x22   :  { %564 = vmatmul.mubr.bf16.vlgmr.msra.gmra.mrb[0].mxu1 %v614_v26  ;;  %238 = vmatmul.mubr.bf16.vlgmr.msra.gmra.mrb[0].mxu0 %v614_v26 }
  0x23   :  { %567 = vmatprep.mubr.msk.bf16.mxu1 %vm620_vm0, %v619_v0  ;;  %247 = vmatprep.mubr.bf16.mxu0 %v621_v3 }
  0x2a   :  { %568 = vmatmul.mubr.bf16.gmra.mrb[4].mxu1 %v615_v27  ;;  %248 = vmatmul.mubr.bf16.gmra.mrb[4].mxu0 %v615_v27 }
  0x2b   :  { %571 = vmatprep.mubr.msk.bf16.mxu1 %vm620_vm0, %v619_v0  ;;  %256 = vmatprep.mubr.bf16.mxu0 %v621_v3 }
  0x32   :  { %572 = vmatmul.mubr.bf16.gmra.mrb[8].mxu1 %v616_v28  ;;  %257 = vmatmul.mubr.bf16.gmra.mrb[8].mxu0 %v616_v28 }
  0xf5   :  { %v300_v29 = vpop.f32.mrb[0].mxu1  ;;  %v239_v30 = vpop.f32.mrb[0].mxu0 }
  0xf6   :  { %v349_v31 = vrot.slane %v300_v29, 2  ;;  %v565_v32 = vpop.f32.mrb[1].mxu1  ;;  %v241_v33 = vpop.f32.mrb[1].mxu0  ;;  %v330_v43 = vadd.f32 %v534_v35, %v239_v30 }
  0xf7   :  { %v303_v34 = vpop.f32.mrb[2].mxu1  ;;  %v243_v36 = vpop.f32.mrb[2].mxu0  ;;  %v336_v40 = vrot.slane %v241_v33, 1 }
  0xf8   :  { %v350_v37 = vrot.slane %v303_v34, 2  ;;  %v566_v38 = vpop.f32.mrb[3].mxu1  ;;  %v245_v39 = vpop.f32.mrb[3].mxu0  ;;  %v331_v57 = vadd.f32 %v534_v35, %v243_v36 }
  0xf9   :  { %v337_v42 = vrot.slane %v245_v39, 1 }
  0xfa   :  { %v351_v41 = vsel %vm348_vm1, %v349_v31, %v350_v37 }
  0xfb   :  { %v338_v44 = vsel %vm335_vm2, %v336_v40, %v337_v42 }
  0xfc   :  { %v343_v45 = vadd.f32 %v338_v44, %v330_v43 }
  0xfd   :  { %v308_v46 = vpop.f32.mrb[4].mxu1  ;;  %v249_v48 = vpop.f32.mrb[4].mxu0 }
  0xfe   :  { %v352_v47 = vrot.slane %v308_v46, 2  ;;  %v569_v49 = vpop.f32.mrb[5].mxu1  ;;  %v356_v50 = vadd.f32 %v351_v41, %v343_v45  ;;  %v250_v51 = vpop.f32.mrb[5].mxu0  ;;  %v433_v45 = vlaneseq }
  0xff   :  { %v311_v52 = vpop.f32.mrb[6].mxu1  ;;  %v339_v54 = vrot.slane %v250_v51, 1  ;;  %v252_v55 = vpop.f32.mrb[6].mxu0 }
 0x100   :  { %v353_v53 = vsel %vm348_vm1, %v350_v37, %v352_v47  ;;  %v570_v56 = vpop.f32.mrb[7].mxu1  ;;  %v254_v58 = vpop.f32.mrb[7].mxu0  ;;  %v390_v63 = vrot.slane %v311_v52, 2  ;;  %v373_v12 = vadd.f32 %v534_v35, %v252_v55  ;;  %v360_v17 = vmul.f32 0.1, %v356_v50 }
 0x101   :  { %v340_v59 = vsel %vm335_vm2, %v337_v42, %v339_v54  ;;  %v378_v5 = vrot.slane %v254_v58, 1  ;;  %vm358_vm4 = vcmp.ge.f32.partialorder %v356_v50, 0.0  ;;  %v434_v46 = vshrl.u32 %v433_v45, 7 }
 0x102   :  { %v344_v60 = vadd.f32 %v340_v59, %v331_v57  ;;  %v767_v24 = vsel %vm358_vm4, %v356_v50, %v360_v17 }
 0x103   :  { %v435_v48 = vsub.s32 0, %v434_v46 }
 0x104   :  { %v357_v61 = vadd.f32 %v353_v53, %v344_v60 }
 0x105   :  { %v316_v62 = vpop.f32.mrb[8].mxu1  ;;  %v258_v1 = vpop.f32.mrb[8].mxu0 }
 0x106   :  { %v391_v0 = vrot.slane %v316_v62, 2  ;;  %v573_v2 = vpop.f32.mrb[9].mxu1  ;;  %v260_v3 = vpop.f32.mrb[9].mxu0  ;;  %v361_v11 = vmul.f32 0.1, %v357_v61  ;;  %vm359_vm3 = vcmp.ge.f32.partialorder %v357_v61, 0.0  ;;  %v374_v18 = vadd.f32 %v534_v35, %v258_v1 }
 0x107   :  { %v319_v4 = vpop.f32.mrb[10].mxu1  ;;  %v379_v7 = vrot.slane %v260_v3, 1  ;;  %v262_v8 = vpop.f32.mrb[10].mxu0 }
 0x108   :  { %v392_v6 = vsel %vm348_vm1, %v390_v63, %v391_v0  ;;  %v393_v9 = vrot.slane %v319_v4, 2  ;;  %v574_v10 = vpop.f32.mrb[11].mxu1  ;;  %v263_v13 = vpop.f32.mrb[11].mxu0  ;;  %v765_v21 = vsel %vm359_vm3, %v357_v61, %v361_v11 }
 0x109   :  { %v380_v14 = vsel %vm335_vm2, %v378_v5, %v379_v7  ;;  %v381_v16 = vrot.slane %v263_v13, 1  ;;  %v411_v27 = vadd.f32 %v765_v21, %v767_v24 }
 0x10a   :  { %v394_v15 = vsel %vm348_vm1, %v391_v0, %v393_v9  ;;  %v385_v19 = vadd.f32 %v380_v14, %v373_v12 }
 0x10b   :  { %v382_v20 = vsel %vm335_vm2, %v379_v7, %v381_v16 }
 0x10c   :  { %v397_v22 = vadd.f32 %v392_v6, %v385_v19  ;;  %v386_v23 = vadd.f32 %v382_v20, %v374_v18  ;;  %v474_v20 = vld [vmem:[%s814_s3] sm:$0x1] }
 0x10e   :  { %vm399_vm5 = vcmp.ge.f32.partialorder %v397_v22, 0.0  ;;  %v401_v25 = vmul.f32 0.1, %v397_v22  ;;  %v398_v26 = vadd.f32 %v394_v15, %v386_v23 }
 0x110   :  { %v771_v28 = vsel %vm399_vm5, %v397_v22, %v401_v25  ;;  %vm400_vm6 = vcmp.ge.f32.partialorder %v398_v26, 0.0  ;;  %v402_v29 = vmul.f32 0.1, %v398_v26  ;;  %v476_v25 = vld [vmem:[%s815_s4] sm:$0x1] }
 0x111   :  { %v412_v30 = vadd.f32 %v411_v27, %v771_v28 }
 0x112   :  { %v774_v31 = vsel %vm400_vm6, %v398_v26, %v402_v29 }
 0x113   :  { %v413_v32 = vadd.f32 %v412_v30, %v774_v31 }
 0x115   :  { %v414_v33 = vrot.slane %v413_v32, 4 }
 0x117   :  { %v415_v34 = vadd.f32 %v414_v33, %v413_v32 }
 0x119   :  { %v416_v35 = vrot.slane %v415_v34, 2 }
 0x11b   :  { %v417_v36 = vadd.f32 %v416_v35, %v415_v34 }
 0x11d   :  { %v418_v37 = vrot.slane %v417_v36, 1 }
 0x11f   :  { %v419_v38 = vadd.f32 %v418_v37, %v417_v36 }
 0x121   :  { %420 = vrot.lane.b32.xlu0 %v419_v38, %s622_s0 }
 0x193   :  { %v421_v39 = vpop.permute.xlu0 %420 }
 0x194   :  { %v422_v40 = vadd.f32 %v421_v39, %v419_v38 }
 0x196   :  { %423 = vrot.lane.b32.xlu0 %v422_v40, %s623_s2 }
 0x208   :  { %v424_v41 = vpop.permute.xlu0 %423 }
 0x209   :  { %v425_v42 = vadd.f32 %v424_v41, %v422_v40 }
 0x20b   :  { %426 = vrot.lane.b32.xlu1 %v425_v42, %s624_s23 }
 0x27d   :  { %v427_v43 = vpop.permute.xlu1 %426 }
 0x27e   :  { %v428_v44 = vadd.f32 %v427_v43, %v425_v42 }
 0x280   :  { %429 = vrot.lane.b32.xlu1 %v428_v44, %s625_s24 }
 0x2f2   :  { %v430_v47 = vpop.permute.xlu1 %429 }
 0x2f3   :  { %v431_v49 = vadd.f32 %v430_v47, %v428_v44 }
 0x2f5   :  { %v432_v50 = vmul.f32 0.001953125, %v431_v49 }
 0x2f7   :  { %v436_v51 = vrot.slane %v432_v50, %v435_v48 }
 0x2f9   :  { %v437_v52 = vsub.f32 %v767_v24, %v436_v51  ;;  %v438_v53 = vsub.f32 %v765_v21, %v436_v51  ;;  %v439_v54 = vsub.f32 %v771_v28, %v436_v51  ;;  %v440_v55 = vsub.f32 %v774_v31, %v436_v51 }
 0x2fb   :  { %v441_v56 = vmul.f32 %v437_v52, %v437_v52  ;;  %v442_v57 = vmul.f32 %v438_v53, %v438_v53  ;;  %v443_v58 = vmul.f32 %v439_v54, %v439_v54  ;;  %v444_v60 = vmul.f32 %v440_v55, %v440_v55 }
 0x2fd   :  { %v445_v59 = vadd.f32 %v442_v57, %v441_v56 }
 0x2ff   :  { %v446_v61 = vadd.f32 %v445_v59, %v443_v58 }
 0x301   :  { %v447_v62 = vadd.f32 %v446_v61, %v444_v60 }
 0x303   :  { %v448_v63 = vrot.slane %v447_v62, 4 }
 0x305   :  { %v449_v0 = vadd.f32 %v448_v63, %v447_v62 }
 0x307   :  { %v450_v1 = vrot.slane %v449_v0, 2 }
 0x309   :  { %v451_v2 = vadd.f32 %v450_v1, %v449_v0 }
 0x30b   :  { %v452_v3 = vrot.slane %v451_v2, 1 }
 0x30d   :  { %v453_v4 = vadd.f32 %v452_v3, %v451_v2 }
 0x30f   :  { %454 = vrot.lane.b32.xlu0 %v453_v4, %s622_s0 }
 0x381   :  { %v455_v5 = vpop.permute.xlu0 %454 }
 0x382   :  { %v456_v6 = vadd.f32 %v455_v5, %v453_v4 }
 0x384   :  { %457 = vrot.lane.b32.xlu1 %v456_v6, %s623_s2 }
 0x3f6   :  { %v458_v7 = vpop.permute.xlu1 %457 }
 0x3f7   :  { %v459_v8 = vadd.f32 %v458_v7, %v456_v6 }
 0x3f9   :  { %460 = vrot.lane.b32.xlu0 %v459_v8, %s624_s23 }
 0x46b   :  { %v461_v9 = vpop.permute.xlu0 %460 }
 0x46c   :  { %v462_v10 = vadd.f32 %v461_v9, %v459_v8 }
 0x46e   :  { %463 = vrot.lane.b32.xlu1 %v462_v10, %s625_s24 }
 0x4e0   :  { %v464_v11 = vpop.permute.xlu1 %463 }
 0x4e1   :  { %v465_v12 = vadd.f32 %v464_v11, %v462_v10 }
 0x4e3   :  { %v466_v13 = vmul.f32 0.001953125, %v465_v12 }
 0x4e5   :  { %v467_v14 = vadd.f32 1e-05, %v466_v13 }
 0x4e7   :  { %617 = vrsqrt.f32 %v467_v14  ;;  %v469_v15 = vmul.f32 0.5, %v467_v14 }
 0x4f1   :  { %v618_v16 = vpop.eup %617 }
 0x4f2   :  { %v470_v17 = vmul.f32 %v618_v16, %v469_v15 }
 0x4f4   :  { %v471_v18 = vmul.f32 %v618_v16, %v470_v17 }
 0x4f6   :  { %v472_v19 = vsub.f32 1.5, %v471_v18 }
 0x4f8   :  { %v473_v22 = vmul.f32 %v618_v16, %v472_v19 }
 0x4fa   :  { %v475_v23 = vmul.f32 %v474_v20, %v473_v22 }
 0x4fc   :  { %v477_v26 = vmul.f32 %v475_v23, %v432_v50  ;;  %v483_v27 = vrot.slane %v475_v23, %v435_v48 }
 0x4fe   :  { %v478_v29 = vsub.f32 %v476_v25, %v477_v26  ;;  %v485_v30 = vmul.f32 %v483_v27, %v767_v24  ;;  %v486_v32 = vmul.f32 %v483_v27, %v765_v21  ;;  %v487_v33 = vmul.f32 %v483_v27, %v771_v28 }
 0x4ff   :  { %v488_v34 = vmul.f32 %v483_v27, %v774_v31 }
 0x500   :  { %v493_v35 = vrot.slane %v478_v29, %v435_v48 }
 0x502   :  { %v495_v36 = vadd.f32 %v493_v35, %v485_v30  ;;  %v496_v37 = vadd.f32 %v493_v35, %v486_v32  ;;  %v497_v38 = vadd.f32 %v493_v35, %v487_v33  ;;  %v498_v39 = vadd.f32 %v493_v35, %v488_v34 }
 0x504   :  { %499 = vst [vmem:[%s816_s5] sm:$0xff] %v495_v36  ;;  %500 = vst [vmem:[%s816_s5 + $0x8] sm:$0xff] %v496_v37 }
 0x505   :  { %501 = vst [vmem:[%s816_s5 + $0x10] sm:$0xff] %v497_v38  ;;  %502 = vst [vmem:[%s816_s5 + $0x18] sm:$0xff] %v498_v39 }

</bundles_post_ra>
